<compile_context>
chip_gen: v6e
topology: v6e:2x2x1
jax: 0.10.0
libtpu: 0.0.40
codegen_flags: <defaults>
</compile_context>

<pallas_src>
import functools

import jax
import jax.numpy as jnp
import numpy as np
from jax.experimental import pallas as pl
from jax.experimental.pallas import tpu as pltpu

BN_EPS = 1e-5


def _transition_kernel(x_ref, sb_ref, w_ref, o_ref):
    # x_ref:  (4, tm, C_in)   4 planes = 2x2 window positions, channels on lanes
    # sb_ref: (2, C_in)       row 0 = folded BN scale, row 1 = folded BN bias (f32)
    # w_ref:  (C_in, C_pad)   1x1 conv weight^T * 0.25, zero-padded to lane-dense cols
    # o_ref:  (tm, C_pad)     f32
    rows, c_in = x_ref.shape[1], x_ref.shape[2]

    # Hoist the (1, C) -> (tm, C) broadcasts once (JAX does not CSE broadcast_in_dim).
    scale = jnp.broadcast_to(sb_ref[0:1, :], (rows, c_in))
    bias = jnp.broadcast_to(sb_ref[1:2, :], (rows, c_in))

    # BN + ReLU per window position, then the 2x2 window sum (pure VPU, f32 math).
    acc = jnp.maximum(x_ref[0].astype(jnp.float32) * scale + bias, 0.0)
    for p in range(1, 4):
        acc = acc + jnp.maximum(x_ref[p].astype(jnp.float32) * scale + bias, 0.0)

    # 1x1 conv on the pooled rows: (tm, C_in) @ (C_in, C_pad), f32 accumulation.
    # (0.25 pool factor already folded into w.)
    o_ref[...] = jnp.dot(acc.astype(w_ref.dtype), w_ref[...],
                         preferred_element_type=jnp.float32).astype(o_ref.dtype)


def _choose_tile(m, tm_req, min_grid_steps):
    """Pick a sublane-aligned tile: large, >= min_grid_steps grid steps, preferring an
    exact divisor of m (no ragged edge block) when one exists near the target."""
    if m <= 8:
        return m                                    # full-dim block is always legal
    tm = min(tm_req, m)
    if min_grid_steps > 1:
        cap = -(-m // min_grid_steps)               # cdiv
        cap = -(-cap // 8) * 8                      # round up to sublane multiple
        tm = min(tm, cap)
    tm = max(8, (tm // 8) * 8)
    t = tm
    while t >= max(8, tm - tm // 2):                # never shrink below ~tm/2 for this
        if m % t == 0:
            return t
        t -= 8
    return tm                                        # ragged last block (Pallas masks it)


def transition_forward(x_nchw, gamma, beta, run_mean, run_var, conv_w, *,
                       tm=1024, in_dtype=jnp.bfloat16, mxu_dtype=jnp.bfloat16,
                       min_grid_steps=2):
    """Pallas implementation of Transition.forward (eval-mode BN), NCHW in / NCHW out."""
    N, C_in, H, W = x_nchw.shape
    C_out = conv_w.shape[0]
    assert H % 2 == 0 and W % 2 == 0
    Ho, Wo = H // 2, W // 2
    M = N * Ho * Wo                                   # pool windows == output pixels

    in_bytes = jnp.dtype(in_dtype).itemsize
    w_bytes = jnp.dtype(mxu_dtype).itemsize
    C_pad = ((C_out + 127) // 128) * 128              # lane-dense output columns
    # TODO(synk): pad to a 256 multiple once the kernel becomes MXU-bound (v6e/v7x MXU).

    # ---- VMEM budget: derive from the actual part instead of hardcoding 64 MiB ----
    try:
        phys_vmem = int(pltpu.get_tpu_info().vmem_capacity_bytes)
    except Exception:
        phys_vmem = 64 * 1024 * 1024                  # conservative (v7x per-core VMEM)
    budget = (phys_vmem * 3) // 4                     # headroom for compiler scratch/spill
    fixed = 2 * C_in * C_pad * w_bytes + 2 * 2 * C_in * 4     # weight + BN consts (2-buf)
    per_row = 2 * 4 * C_in * in_bytes + 2 * C_pad * 4         # streamed input + output
    tm_budget = max(8, (budget - fixed) // per_row)
    tm = _choose_tile(M, min(tm, int(tm_budget)), min_grid_steps)
    vmem_limit = int(min(budget, max(32 * 1024 * 1024,
                                     fixed + per_row * tm + 4 * 1024 * 1024)))

    # ---- fold BN into scale/bias: z = x*scale + bias ----
    scale = gamma * jax.lax.rsqrt(run_var + BN_EPS)
    bias = beta - run_mean * scale
    sb = jnp.stack([scale, bias], axis=0).astype(jnp.float32)        # (2, C_in)

    # ---- 1x1 conv weight: transpose, fold the exact 0.25 pool factor, pad lanes ----
    wt = (0.25 * conv_w[:, :, 0, 0].astype(jnp.float32)).T.astype(mxu_dtype)  # (C_in, C_out)
    if C_pad != C_out:
        wt = jnp.pad(wt, ((0, 0), (0, C_pad - C_out)))                # (C_in, C_pad)

    # ---- relayout NCHW -> (4, M, C_in) in the streaming dtype ----
    # Cast first so the transpose moves bf16; XLA fuses cast+transpose into one pass
    # (read f32, write bf16).  This pass is unavoidable for channels-first input.
    # TODO(synk): accept NHWC input upstream to drop this relayout pass entirely.
    x = x_nchw.astype(in_dtype).reshape(N, C_in, Ho, 2, Wo, 2)
    x_planes = jnp.transpose(x, (3, 5, 0, 2, 4, 1)).reshape(4, M, C_in)

    grid = (pl.cdiv(M, tm),)
    # NOTE: sb/wt are grid-invariant; pipeline_mode=pl.Buffered(1) would save one weight
    # copy of VMEM on 64 MiB parts; kept default-buffered here for lowering robustness.
    out_pad = pl.pallas_call(
        _transition_kernel,
        out_shape=jax.ShapeDtypeStruct((M, C_pad), jnp.float32),
        grid_spec=pltpu.PrefetchScalarGridSpec(
            num_scalar_prefetch=0,
            grid=grid,
            in_specs=[
                pl.BlockSpec((4, tm, C_in), lambda i: (0, i, 0)),   # streamed activation
                pl.BlockSpec((2, C_in), lambda i: (0, 0)),          # folded BN scale/bias
                pl.BlockSpec((C_in, C_pad), lambda i: (0, 0)),      # conv weight (* 0.25)
            ],
            out_specs=pl.BlockSpec((tm, C_pad), lambda i: (i, 0)),
        ),
        compiler_params=pltpu.CompilerParams(
            dimension_semantics=("parallel",),
            vmem_limit_bytes=vmem_limit,
        ),
    )(x_planes, sb, wt)

    # ---- glue: drop lane padding, back to NCHW (output is ~1/8 of input bytes) ----
    # TODO(synk): return NHWC / bf16 directly when the downstream consumer accepts it.
    out = out_pad[:, :C_out] if C_pad != C_out else out_pad
    out = out.reshape(N, Ho, Wo, C_out)
    return jnp.transpose(out, (0, 3, 1, 2))


def transition_reference(x, gamma, beta, mean, var, conv_w):
    """Pure-JAX reference of the PyTorch module (eval-mode BN)."""
    inv = 1.0 / jnp.sqrt(var + BN_EPS)
    z = (x - mean[None, :, None, None]) * (gamma * inv)[None, :, None, None] \
        + beta[None, :, None, None]
    z = jnp.maximum(z, 0.0)
    y = jnp.einsum('nchw,oc->nohw', z, conv_w[:, :, 0, 0])
    N, Co, H, W = y.shape
    y = y.reshape(N, Co, H // 2, 2, W // 2, 2).mean(axis=(3, 5))
    return y


if __name__ == "__main__":
    # Small deterministic problem: N=2, C_in=8, C_out=4, H=W=16
    N, C_in, C_out, H, W = 2, 8, 4, 16, 16
    key = jax.random.PRNGKey(0)
    kx, kg, kb, km, kv, kw = jax.random.split(key, 6)

    x = jax.random.normal(kx, (N, C_in, H, W), dtype=jnp.float32)
    gamma = jax.random.uniform(kg, (C_in,), minval=0.5, maxval=1.5, dtype=jnp.float32)
    beta = 0.1 * jax.random.normal(kb, (C_in,), dtype=jnp.float32)
    run_mean = 0.1 * jax.random.normal(km, (C_in,), dtype=jnp.float32)
    run_var = jax.random.uniform(kv, (C_in,), minval=0.5, maxval=1.5, dtype=jnp.float32)
    conv_w = (jnp.sqrt(2.0 / C_in)
              * jax.random.normal(kw, (C_out, C_in, 1, 1), dtype=jnp.float32))

    ref = transition_reference(x, gamma, beta, run_mean, run_var, conv_w)

    # Fast path: bf16 streaming + bf16 MXU inputs, f32 accumulation.
    # M=128 -> tm=64 -> 2-step parallel grid (exercises pipelining / megacore sharding).
    fwd_fast = jax.jit(transition_forward)
    out_fast = jax.block_until_ready(fwd_fast(x, gamma, beta, run_mean, run_var, conv_w))
    assert out_fast.shape == (N, C_out, H // 2, W // 2), out_fast.shape
    np.testing.assert_allclose(np.asarray(out_fast), np.asarray(ref),
                               rtol=3e-2, atol=3e-2)

    # Strict path: f32 streaming + f32 MXU, smaller tile -> 4-step grid.
    fwd_strict = jax.jit(functools.partial(
        transition_forward, tm=32, in_dtype=jnp.float32, mxu_dtype=jnp.float32))
    out_f32 = jax.block_until_ready(fwd_strict(x, gamma, beta, run_mean, run_var, conv_w))
    np.testing.assert_allclose(np.asarray(out_f32), np.asarray(ref),
                               rtol=1e-4, atol=1e-5)

    print("KERNEL_OK")
</pallas_src>

<mosaic_0001>
module attributes {stable_mosaic.version = 11 : i64} {
  func.func @_transition_kernel(%arg0: i32, %arg1: memref<4x64x8xbf16, #tpu.memory_space<vmem>>, %arg2: memref<2x8xf32, #tpu.memory_space<vmem>>, %arg3: memref<8x128xbf16, #tpu.memory_space<vmem>>, %arg4: memref<64x128xf32, #tpu.memory_space<vmem>>) attributes {dimension_semantics = [#tpu.dimension_semantics<parallel>], iteration_bounds = array<i64: 2>, scalar_prefetch = 0 : i64, scratch_operands = 0 : i64, tpu.core_type = #tpu.core_type<tc>, window_params = [{transform_indices = @transform_0, window_bounds = array<i64: 4, 64, 8>}, {pipeline_mode = #tpu.pipeline_mode<synchronous>, transform_indices = @transform_1, window_bounds = array<i64: 2, 8>}, {pipeline_mode = #tpu.pipeline_mode<synchronous>, transform_indices = @transform_2, window_bounds = array<i64: 8, 128>}, {transform_indices = @transform_3, window_bounds = array<i64: 64, 128>}]} {
    %c0 = arith.constant 0 : index
    %c0_0 = arith.constant 0 : index
    %0 = vector.load %arg2[%c0, %c0_0] : memref<2x8xf32, #tpu.memory_space<vmem>>, vector<1x8xf32>
    %1 = vector.shape_cast %0 : vector<1x8xf32> to vector<1x8xf32>
    %2 = vector.broadcast %1 : vector<1x8xf32> to vector<64x8xf32>
    %c1 = arith.constant 1 : index
    %c0_1 = arith.constant 0 : index
    %3 = vector.load %arg2[%c1, %c0_1] : memref<2x8xf32, #tpu.memory_space<vmem>>, vector<1x8xf32>
    %4 = vector.shape_cast %3 : vector<1x8xf32> to vector<1x8xf32>
    %5 = vector.broadcast %4 : vector<1x8xf32> to vector<64x8xf32>
    %c0_2 = arith.constant 0 : index
    %c0_3 = arith.constant 0 : index
    %c0_4 = arith.constant 0 : index
    %6 = vector.load %arg1[%c0_2, %c0_3, %c0_4] : memref<4x64x8xbf16, #tpu.memory_space<vmem>>, vector<1x64x8xbf16>
    %7 = vector.shape_cast %6 : vector<1x64x8xbf16> to vector<64x8xbf16>
    %8 = arith.extf %7 : vector<64x8xbf16> to vector<64x8xf32>
    %9 = arith.mulf %8, %2 : vector<64x8xf32>
    %10 = arith.addf %9, %5 : vector<64x8xf32>
    %cst = arith.constant 0.000000e+00 : f32
    %11 = vector.broadcast %cst : f32 to vector<64x8xf32>
    %12 = arith.maximumf %10, %11 : vector<64x8xf32>
    %c1_5 = arith.constant 1 : index
    %c0_6 = arith.constant 0 : index
    %c0_7 = arith.constant 0 : index
    %13 = vector.load %arg1[%c1_5, %c0_6, %c0_7] : memref<4x64x8xbf16, #tpu.memory_space<vmem>>, vector<1x64x8xbf16>
    %14 = vector.shape_cast %13 : vector<1x64x8xbf16> to vector<64x8xbf16>
    %15 = arith.extf %14 : vector<64x8xbf16> to vector<64x8xf32>
    %16 = arith.mulf %15, %2 : vector<64x8xf32>
    %17 = arith.addf %16, %5 : vector<64x8xf32>
    %cst_8 = arith.constant 0.000000e+00 : f32
    %18 = vector.broadcast %cst_8 : f32 to vector<64x8xf32>
    %19 = arith.maximumf %17, %18 : vector<64x8xf32>
    %20 = arith.addf %12, %19 : vector<64x8xf32>
    %c2 = arith.constant 2 : index
    %c0_9 = arith.constant 0 : index
    %c0_10 = arith.constant 0 : index
    %21 = vector.load %arg1[%c2, %c0_9, %c0_10] : memref<4x64x8xbf16, #tpu.memory_space<vmem>>, vector<1x64x8xbf16>
    %22 = vector.shape_cast %21 : vector<1x64x8xbf16> to vector<64x8xbf16>
    %23 = arith.extf %22 : vector<64x8xbf16> to vector<64x8xf32>
    %24 = arith.mulf %23, %2 : vector<64x8xf32>
    %25 = arith.addf %24, %5 : vector<64x8xf32>
    %cst_11 = arith.constant 0.000000e+00 : f32
    %26 = vector.broadcast %cst_11 : f32 to vector<64x8xf32>
    %27 = arith.maximumf %25, %26 : vector<64x8xf32>
    %28 = arith.addf %20, %27 : vector<64x8xf32>
    %c3 = arith.constant 3 : index
    %c0_12 = arith.constant 0 : index
    %c0_13 = arith.constant 0 : index
    %29 = vector.load %arg1[%c3, %c0_12, %c0_13] : memref<4x64x8xbf16, #tpu.memory_space<vmem>>, vector<1x64x8xbf16>
    %30 = vector.shape_cast %29 : vector<1x64x8xbf16> to vector<64x8xbf16>
    %31 = arith.extf %30 : vector<64x8xbf16> to vector<64x8xf32>
    %32 = arith.mulf %31, %2 : vector<64x8xf32>
    %33 = arith.addf %32, %5 : vector<64x8xf32>
    %cst_14 = arith.constant 0.000000e+00 : f32
    %34 = vector.broadcast %cst_14 : f32 to vector<64x8xf32>
    %35 = arith.maximumf %33, %34 : vector<64x8xf32>
    %36 = arith.addf %28, %35 : vector<64x8xf32>
    %37 = arith.truncf %36 : vector<64x8xf32> to vector<64x8xbf16>
    %c0_15 = arith.constant 0 : index
    %c0_16 = arith.constant 0 : index
    %38 = vector.load %arg3[%c0_15, %c0_16] : memref<8x128xbf16, #tpu.memory_space<vmem>>, vector<8x128xbf16>
    %cst_17 = arith.constant dense<0.000000e+00> : vector<64x128xf32>
    %39 = tpu.matmul %37, %38, %cst_17 {dimension_numbers = #tpu.dot_dimension_numbers<[1], [0], [0], [1], [0, 0, 1, 1], [], []>} : vector<64x8xbf16>, vector<8x128xbf16>, vector<64x128xf32> -> vector<64x128xf32>
    %c0_18 = arith.constant 0 : index
    %c0_19 = arith.constant 0 : index
    %40 = vector.load %arg4[%c0_18, %c0_19] : memref<64x128xf32, #tpu.memory_space<vmem>>, vector<64x128xf32>
    tpu.vector_store %arg4[%c0_18, %c0_19], %39 {strides = array<i32>} : memref<64x128xf32, #tpu.memory_space<vmem>>, vector<64x128xf32>,
    return
  }
  func.func @transform_0(%arg0: i32) -> (i32, i32, i32) {
    %c0_i32 = arith.constant 0 : i32
    %c0_i32_0 = arith.constant 0 : i32
    %c0_i32_1 = arith.constant 0 : i32
    return %c0_i32, %arg0, %c0_i32_0 : i32, i32, i32
  }
  func.func @transform_1(%arg0: i32) -> (i32, i32) {
    %c0_i32 = arith.constant 0 : i32
    %c0_i32_0 = arith.constant 0 : i32
    %c0_i32_1 = arith.constant 0 : i32
    return %c0_i32, %c0_i32_0 : i32, i32
  }
  func.func @transform_2(%arg0: i32) -> (i32, i32) {
    %c0_i32 = arith.constant 0 : i32
    %c0_i32_0 = arith.constant 0 : i32
    %c0_i32_1 = arith.constant 0 : i32
    return %c0_i32, %c0_i32_0 : i32, i32
  }
  func.func @transform_3(%arg0: i32) -> (i32, i32) {
    %c0_i32 = arith.constant 0 : i32
    %c0_i32_0 = arith.constant 0 : i32
    return %arg0, %c0_i32 : i32, i32
  }
}

</mosaic_0001>

<bundles_post_ra>
// kernel: transition_forward.1
= control target key start
LH: loop header
LB: loop body
LE: loop exit
PB: predicated region body
PF: predicated region fallthrough
CT: control target
= control target key end

     0   :  { %s906_s12 = smov 0   ;;  %s908_s13 = smov 0   ;;  %s1075_s0 = inlined_call_operand.vmem [shape: bf16[4,128,8], index: 0, kind: input, shape index: {}]   ;;  %s1076_s1 = inlined_call_operand.vmem [shape: f32[2,8], index: 1, kind: input, shape index: {}]   ;;  %s1077_s2 = inlined_call_operand.vmem [shape: bf16[8,128], index: 2, kind: input, shape index: {}]   ;;  %s1078_s3 = inlined_call_operand.vmem [shape: f32[128,128], index: 3, kind: output, shape index: {}]  }
   0x1   :  { %s910_s14 = smov 0  }
   0x2 LB: > { %s696_s15 = sadd.s32 4294967295, %s884_s14   ;;  %s923_s16 = sadd.s32 1, %s884_s14   ;;  %s884_s14 = sphi %s910_s14, %s1081_s14   ;;  %s880_s13 = sphi %s908_s13, %s1080_s13   ;;  %s876_s12 = sphi %s906_s12, %s1079_s12  }
   0x3   : > { %s17_s17 = ssub.s32 %s884_s14, %s923_s16  ;;  %s20_s18 = sadd.s32 1, %s880_s13 }
   0x4   : > { %p18_p0 = scmp.eq.s32.totalorder %s17_s17, 0  ;;  %p27_p1 = scmp.ne.s32.totalorder %s880_s13, %s876_s12 }
   0x5   : > { %p28_p2 = scmp.eq.s32.totalorder %s884_s14, 0  ;;  %p699_p4 = scmp.ge.s32.totalorder %s884_s14, 2 }
   0x6   : > { %s932_s19 = scalar_select %p18_p0, %s880_s13, %s20_s18  }
   0x7   : > { %p29_p3 = por %p28_p2, %p27_p1  ;;  %127 = sbr.rel (%p699_p4) target bundleno = 24 (0x18), region = 24 }
   0xc   : > { %130 = sbr.rel (!%p29_p3) target bundleno = 24 (0x18), region = 28  ;;  %s132_s20 = sand.u32 (%p29_p3), 1, %s880_s13  }
   0xd   : > { %s739_s21 = sshll.u32 (%p29_p3), %s884_s14, 5  ;;  %s700_s22 = sshll.u32 (%p29_p3), %s132_s20, 7 }
   0xe   : > { %s940_s25 = scalar_lea.vmem (%p29_p3), %s1075_s0, %s739_s21  ;;  %s134_s26 = scalar_lea.vmem (%p29_p3), [#allocation2], %s700_s22 }
   0xf   : > { %v154_v0 = vld [vmem:[%s940_s25] sm:$0xff] (%p29_p3)   ;;  %v158_v1 = vld [vmem:[%s940_s25 + $0x8] sm:$0xff] (%p29_p3)   ;;  %v162_v2 = vld [vmem:[%s940_s25 + $0x10] sm:$0xff] (%p29_p3)  }
  0x10   : > { %155 = vst [vmem:[%s134_s26] sm:$0xff] (%p29_p3), %v154_v0   ;;  %159 = vst [vmem:[%s134_s26 + $0x8] sm:$0xff] (%p29_p3), %v158_v1   ;;  %v166_v3 = vld [vmem:[%s940_s25 + $0x18] sm:$0xff] (%p29_p3)   ;;  %v170_v4 = vld [vmem:[%s940_s25 + $0x40] sm:$0xff] (%p29_p3)  }
  0x11   : > { %163 = vst [vmem:[%s134_s26 + $0x10] sm:$0xff] %v162_v2   ;;  %v174_v5 = vld [vmem:[%s940_s25 + $0x48] sm:$0xff]   ;;  %167 = vst [vmem:[%s134_s26 + $0x18] sm:$0xff] %v166_v3   ;;  %v178_v6 = vld [vmem:[%s940_s25 + $0x50] sm:$0xff]  }
  0x12   : > { %171 = vst [vmem:[%s134_s26 + $0x20] sm:$0xff] %v170_v4   ;;  %175 = vst [vmem:[%s134_s26 + $0x28] sm:$0xff] %v174_v5   ;;  %v182_v7 = vld [vmem:[%s940_s25 + $0x58] sm:$0xff]   ;;  %v186_v8 = vld [vmem:[%s940_s25 + $0x80] sm:$0xff]  }
  0x13   : > { %179 = vst [vmem:[%s134_s26 + $0x30] sm:$0xff] %v178_v6   ;;  %183 = vst [vmem:[%s134_s26 + $0x38] sm:$0xff] %v182_v7   ;;  %v190_v9 = vld [vmem:[%s940_s25 + $0x88] sm:$0xff]   ;;  %v194_v10 = vld [vmem:[%s940_s25 + $0x90] sm:$0xff]  }
  0x14   : > { %187 = vst [vmem:[%s134_s26 + $0x40] sm:$0xff] %v186_v8   ;;  %v198_v11 = vld [vmem:[%s940_s25 + $0x98] sm:$0xff]   ;;  %191 = vst [vmem:[%s134_s26 + $0x48] sm:$0xff] %v190_v9   ;;  %v202_v12 = vld [vmem:[%s940_s25 + $0xc0] sm:$0xff]  }
  0x15   : > { %195 = vst [vmem:[%s134_s26 + $0x50] sm:$0xff] %v194_v10   ;;  %199 = vst [vmem:[%s134_s26 + $0x58] sm:$0xff] %v198_v11   ;;  %v206_v13 = vld [vmem:[%s940_s25 + $0xc8] sm:$0xff]   ;;  %v210_v14 = vld [vmem:[%s940_s25 + $0xd0] sm:$0xff]  }
  0x16   : > { %203 = vst [vmem:[%s134_s26 + $0x60] sm:$0xff] %v202_v12   ;;  %207 = vst [vmem:[%s134_s26 + $0x68] sm:$0xff] %v206_v13   ;;  %v214_v15 = vld [vmem:[%s940_s25 + $0xd8] sm:$0xff]  }
  0x17   : > { %211 = vst [vmem:[%s134_s26 + $0x70] sm:$0xff] %v210_v14   ;;  %215 = vst [vmem:[%s134_s26 + $0x78] sm:$0xff] %v214_v15  }
  0x18 PF: > { %p703_p5 = scmp.ge.s32.totalorder %s884_s14, 1  ;;  %p304_p6 = scmp.lt.s32.totalorder %s884_s14, 3 }
  0x1a   : > { %p305_p7 = pnand %p703_p5, %p304_p6 }
  0x1b   : > { %s311_s29 = sand.u32 (!%p305_p7), 1, %s876_s12   ;;  %s705_s9 = sshll.u32 (!%p305_p7), %s696_s15, 3 }
  0x1c   : > { %308 = sbr.rel (%p305_p7) target bundleno = 281 (0x119), region = 69  ;;  %s704_s30 = sshll.u32 (!%p305_p7), %s311_s29, 7 }
  0x1d   : > { %s969_s6 = scalar_lea.vmem (!%p305_p7), [#allocation2], %s704_s30  ;;  %p336_p8 = scmp.lt.s32.totalorder (!%p305_p7), %s705_s9, 15 }
  0x21   : > { %v543_v16 = vld [vmem:[%s1077_s2] sm:$0xf]  ;;  %vm557_vm0 = vcmask 1043456   ;;  %vm544_vm1 = vcmask 64512   ;;  %v805_v48 = vld [vmem:[%s969_s6 + $0x10] sm:$0xff]   ;;  %s1083_s9 = smov (!%p336_p8, %s705_s9), 15 }
  0x22   : > { %836 = vmatprep.subr.msk.bf16.mxu0 %vm557_vm0, %v543_v16  ;;  %837 = vmatprep.subr.msk.bf16.mxu1 %vm557_vm0, %v543_v16  ;;  %v559_v17 = vsel %vm557_vm0, %v543_v16, 0  ;;  %v967_v18 = vld [vmem:[%s1076_s1] ss:$0 sm:$0xff]  ;;  %v978_v27 = vld [vmem:[%s1076_s1 + $0x1] ss:$0 sm:$0xff]  ;;  %v809_v53 = vld [vmem:[%s969_s6 + $0x30] sm:$0xff]   ;;  %v750_v61 = vunpack.c.l.bf16 %v805_v48  ;;  %v751_v62 = vunpack.c.h.bf16 %v805_v48 }
  0x23   : > { %825 = vmatpush3.bf16.msra.mxu0 %v559_v17  ;;  %835 = vmatpush3.bf16.msra.mxu1 %v559_v17  ;;  %v741_v19 = vld [vmem:[%s969_s6] sm:$0xff]   ;;  %v813_v54 = vld [vmem:[%s969_s6 + $0x50] sm:$0xff]   ;;  %v766_v63 = vunpack.c.l.bf16 %v809_v53  ;;  %v767_v0 = vunpack.c.h.bf16 %v809_v53  ;;  %s706_s10 = sshll.u32 %s1083_s9, 3 }
  0x24   : > { %v807_v20 = vld [vmem:[%s969_s6 + $0x20] sm:$0xff]   ;;  %v742_v22 = vunpack.c.l.bf16 %v741_v19  ;;  %v743_v23 = vunpack.c.h.bf16 %v741_v19  ;;  %v782_v1 = vunpack.c.l.bf16 %v813_v54  ;;  %v783_v2 = vunpack.c.h.bf16 %v813_v54  ;;  %v817_v11 = vld [vmem:[%s969_s6 + $0x70] sm:$0xff]   ;;  %s339_s17 = scalar_lea.vmem %s1078_s3, %s706_s10 }
  0x25   : > { %v811_v21 = vld [vmem:[%s969_s6 + $0x40] sm:$0xff]   ;;  %v758_v24 = vunpack.c.l.bf16 %v807_v20  ;;  %v759_v25 = vunpack.c.h.bf16 %v807_v20  ;;  %v372_v5 = vmul.f32 %v750_v61, %v967_v18  ;;  %v373_v6 = vmul.f32 %v751_v62, %v967_v18 }
  0x26   : > { %v815_v26 = vld [vmem:[%s969_s6 + $0x60] sm:$0xff]   ;;  %v774_v28 = vunpack.c.l.bf16 %v811_v21  ;;  %v775_v29 = vunpack.c.h.bf16 %v811_v21  ;;  %v368_v32 = vmul.f32 %v742_v22, %v967_v18  ;;  %v369_v33 = vmul.f32 %v743_v23, %v967_v18  ;;  %v804_v21 = vld [vmem:[%s969_s6 + $0x8] sm:$0xff]  }
  0x27   : > { %v790_v30 = vunpack.c.l.bf16 %v815_v26  ;;  %v791_v31 = vunpack.c.h.bf16 %v815_v26  ;;  %v409_v34 = vmul.f32 %v758_v24, %v967_v18  ;;  %v410_v35 = vmul.f32 %v759_v25, %v967_v18  ;;  %v808_v26 = vld [vmem:[%s969_s6 + $0x28] sm:$0xff]  }
  0x28   : > { %v458_v36 = vmul.f32 %v774_v28, %v967_v18  ;;  %v459_v37 = vmul.f32 %v775_v29, %v967_v18  ;;  %v376_v40 = vadd.f32 %v978_v27, %v368_v32  ;;  %v377_v41 = vadd.f32 %v978_v27, %v369_v33 }
  0x29   : > { %v507_v38 = vmul.f32 %v790_v30, %v967_v18  ;;  %v508_v39 = vmul.f32 %v791_v31, %v967_v18  ;;  %v417_v42 = vadd.f32 %v978_v27, %v409_v34  ;;  %v418_v43 = vadd.f32 %v978_v27, %v410_v35 }
  0x2a   : > { %v466_v44 = vadd.f32 %v978_v27, %v458_v36  ;;  %v467_v45 = vadd.f32 %v978_v27, %v459_v37  ;;  %v384_v49 = vmax.f32 %v376_v40, 0.0  ;;  %v385_v50 = vmax.f32 %v377_v41, 0.0 }
  0x2b   : > { %v515_v46 = vadd.f32 %v978_v27, %v507_v38  ;;  %v516_v47 = vadd.f32 %v978_v27, %v508_v39  ;;  %v425_v51 = vmax.f32 %v417_v42, 0.0  ;;  %v426_v52 = vmax.f32 %v418_v43, 0.0 }
  0x2c   : > { %v474_v55 = vmax.f32 %v466_v44, 0.0  ;;  %v475_v56 = vmax.f32 %v467_v45, 0.0  ;;  %v413_v7 = vmul.f32 %v766_v63, %v967_v18  ;;  %v414_v8 = vmul.f32 %v767_v0, %v967_v18  ;;  %v812_v44 = vld [vmem:[%s969_s6 + $0x48] sm:$0xff]  }
  0x2d   : > { %v523_v57 = vmax.f32 %v515_v46, 0.0  ;;  %v524_v58 = vmax.f32 %v516_v47, 0.0  ;;  %v433_v59 = vadd.f32 %v425_v51, %v384_v49  ;;  %v434_v60 = vadd.f32 %v426_v52, %v385_v50 }
  0x2e   : > { %v462_v9 = vmul.f32 %v782_v1, %v967_v18  ;;  %v463_v10 = vmul.f32 %v783_v2, %v967_v18  ;;  %v380_v14 = vadd.f32 %v978_v27, %v372_v5  ;;  %v381_v15 = vadd.f32 %v978_v27, %v373_v6 }
  0x2f   : > { %v482_v3 = vadd.f32 %v474_v55, %v433_v59  ;;  %v483_v4 = vadd.f32 %v475_v56, %v434_v60  ;;  %v421_v16 = vadd.f32 %v978_v27, %v413_v7  ;;  %v422_v17 = vadd.f32 %v978_v27, %v414_v8  ;;  %v810_v7 = vld [vmem:[%s969_s6 + $0x38] sm:$0xff]  }
  0x30   : > { %v470_v19 = vadd.f32 %v978_v27, %v462_v9  ;;  %v471_v20 = vadd.f32 %v978_v27, %v463_v10  ;;  %v388_v23 = vmax.f32 %v380_v14, 0.0  ;;  %v389_v24 = vmax.f32 %v381_v15, 0.0 }
  0x31   : > { %v531_v12 = vadd.f32 %v523_v57, %v482_v3  ;;  %v532_v13 = vadd.f32 %v524_v58, %v483_v4  ;;  %v798_v25 = vunpack.c.l.bf16 %v817_v11  ;;  %v429_v28 = vmax.f32 %v421_v16, 0.0  ;;  %v816_v57 = vld [vmem:[%s969_s6 + $0x68] sm:$0xff]   ;;  %v806_v58 = vld [vmem:[%s969_s6 + $0x18] sm:$0xff]  }
  0x32   : > { %v430_v29 = vmax.f32 %v422_v17, 0.0  ;;  %v478_v30 = vmax.f32 %v470_v19, 0.0  ;;  %v479_v31 = vmax.f32 %v471_v20, 0.0  ;;  %v799_v32 = vunpack.c.h.bf16 %v817_v11 }
  0x33   : > { %v539_v22 = vpack.c.bf16 %v532_v13, %v531_v12  ;;  %v511_v33 = vmul.f32 %v798_v25, %v967_v18  ;;  %v746_v34 = vunpack.c.l.bf16 %v804_v21  ;;  %v747_v35 = vunpack.c.h.bf16 %v804_v21  ;;  %v814_v25 = vld [vmem:[%s969_s6 + $0x58] sm:$0xff]  }
  0x34   : > { %v437_v36 = vadd.f32 %v429_v28, %v388_v23  ;;  %v438_v37 = vadd.f32 %v430_v29, %v389_v24  ;;  %v762_v38 = vunpack.c.l.bf16 %v808_v26  ;;  %v763_v39 = vunpack.c.h.bf16 %v808_v26 }
  0x35   : > { %826 = vmatprep.mubr.msk.bf16.mxu0 %vm544_vm1, %v539_v22  ;;  %v512_v40 = vmul.f32 %v799_v32, %v967_v18  ;;  %v519_v41 = vadd.f32 %v978_v27, %v511_v33  ;;  %v370_v42 = vmul.f32 %v746_v34, %v967_v18  ;;  %v371_v43 = vmul.f32 %v747_v35, %v967_v18  ;;  %v818_v35 = vld [vmem:[%s969_s6 + $0x78] sm:$0xff]  }
  0x36   : > { %v486_v45 = vadd.f32 %v478_v30, %v437_v36  ;;  %v487_v46 = vadd.f32 %v479_v31, %v438_v37  ;;  %v411_v47 = vmul.f32 %v762_v38, %v967_v18  ;;  %v412_v48 = vmul.f32 %v763_v39, %v967_v18 }
  0x37   : > { %v520_v49 = vadd.f32 %v978_v27, %v512_v40  ;;  %v527_v50 = vmax.f32 %v519_v41, 0.0  ;;  %v378_v51 = vadd.f32 %v978_v27, %v370_v42  ;;  %v379_v52 = vadd.f32 %v978_v27, %v371_v43 }
  0x38   : > { %v419_v53 = vadd.f32 %v978_v27, %v411_v47  ;;  %v420_v54 = vadd.f32 %v978_v27, %v412_v48  ;;  %v778_v55 = vunpack.c.l.bf16 %v812_v44  ;;  %v779_v56 = vunpack.c.h.bf16 %v812_v44 }
  0x39   : > { %v528_v59 = vmax.f32 %v520_v49, 0.0  ;;  %v535_v60 = vadd.f32 %v527_v50, %v486_v45  ;;  %v386_v61 = vmax.f32 %v378_v51, 0.0  ;;  %v387_v62 = vmax.f32 %v379_v52, 0.0 }
  0x3a   : > { %v427_v63 = vmax.f32 %v419_v53, 0.0  ;;  %v428_v0 = vmax.f32 %v420_v54, 0.0  ;;  %v460_v1 = vmul.f32 %v778_v55, %v967_v18  ;;  %v461_v2 = vmul.f32 %v779_v56, %v967_v18 }
  0x3b   : > { %v536_v3 = vadd.f32 %v528_v59, %v487_v46  ;;  %v794_v4 = vunpack.c.l.bf16 %v816_v57  ;;  %v795_v5 = vunpack.c.h.bf16 %v816_v57  ;;  %v754_v6 = vunpack.c.l.bf16 %v806_v58 }
  0x3c   : > { %v435_v8 = vadd.f32 %v427_v63, %v386_v61  ;;  %v436_v9 = vadd.f32 %v428_v0, %v387_v62  ;;  %v468_v10 = vadd.f32 %v978_v27, %v460_v1  ;;  %v469_v11 = vadd.f32 %v978_v27, %v461_v2 }
  0x3d   : > { %v541_v12 = vpack.c.bf16 %v536_v3, %v535_v60  ;;  %v509_v13 = vmul.f32 %v794_v4, %v967_v18  ;;  %v510_v14 = vmul.f32 %v795_v5, %v967_v18  ;;  %v755_v15 = vunpack.c.h.bf16 %v806_v58 }
  0x3e   : > { %v476_v16 = vmax.f32 %v468_v10, 0.0  ;;  %v477_v17 = vmax.f32 %v469_v11, 0.0  ;;  %v374_v19 = vmul.f32 %v754_v6, %v967_v18  ;;  %v770_v20 = vunpack.c.l.bf16 %v810_v7 }
  0x3f   : > { %830 = vmatprep.mubr.msk.bf16.mxu1 %vm544_vm1, %v541_v12  ;;  %v517_v21 = vadd.f32 %v978_v27, %v509_v13  ;;  %v518_v22 = vadd.f32 %v978_v27, %v510_v14  ;;  %v375_v23 = vmul.f32 %v755_v15, %v967_v18  ;;  %v771_v24 = vunpack.c.h.bf16 %v810_v7 }
  0x40   : > { %v484_v26 = vadd.f32 %v476_v16, %v435_v8  ;;  %v485_v28 = vadd.f32 %v477_v17, %v436_v9  ;;  %v382_v29 = vadd.f32 %v978_v27, %v374_v19  ;;  %v415_v30 = vmul.f32 %v770_v20, %v967_v18 }
  0x41   : > { %v525_v31 = vmax.f32 %v517_v21, 0.0  ;;  %v526_v32 = vmax.f32 %v518_v22, 0.0  ;;  %v383_v33 = vadd.f32 %v978_v27, %v375_v23  ;;  %v416_v34 = vmul.f32 %v771_v24, %v967_v18 }
  0x42   : > { %v390_v36 = vmax.f32 %v382_v29, 0.0  ;;  %v423_v37 = vadd.f32 %v978_v27, %v415_v30  ;;  %v786_v38 = vunpack.c.l.bf16 %v814_v25  ;;  %v787_v39 = vunpack.c.h.bf16 %v814_v25 }
  0x43   : > { %v533_v40 = vadd.f32 %v525_v31, %v484_v26  ;;  %v534_v41 = vadd.f32 %v526_v32, %v485_v28  ;;  %v391_v42 = vmax.f32 %v383_v33, 0.0  ;;  %v424_v43 = vadd.f32 %v978_v27, %v416_v34 }
  0x44   : > { %v431_v44 = vmax.f32 %v423_v37, 0.0  ;;  %v464_v45 = vmul.f32 %v786_v38, %v967_v18  ;;  %v465_v46 = vmul.f32 %v787_v39, %v967_v18  ;;  %v802_v47 = vunpack.c.l.bf16 %v818_v35 }
  0x45   : > { %v540_v48 = vpack.c.bf16 %v534_v41, %v533_v40  ;;  %v432_v49 = vmax.f32 %v424_v43, 0.0  ;;  %v803_v50 = vunpack.c.h.bf16 %v818_v35 }
  0x46   : > { %v439_v51 = vadd.f32 %v431_v44, %v390_v36  ;;  %v472_v52 = vadd.f32 %v978_v27, %v464_v45  ;;  %v473_v53 = vadd.f32 %v978_v27, %v465_v46  ;;  %v513_v54 = vmul.f32 %v802_v47, %v967_v18 }
  0x47   : > { %827 = vmatmul.mubr.msk.bf16.vlgmr.msra.gmra.mxu0 %vm544_vm1, %v540_v48  ;;  %v440_v55 = vadd.f32 %v432_v49, %v391_v42  ;;  %v514_v56 = vmul.f32 %v803_v50, %v967_v18 }
  0x48   : > { %v480_v57 = vmax.f32 %v472_v52, 0.0  ;;  %v481_v58 = vmax.f32 %v473_v53, 0.0  ;;  %v521_v59 = vadd.f32 %v978_v27, %v513_v54 }
  0x49   : > { %v522_v60 = vadd.f32 %v978_v27, %v514_v56 }
  0x4a   : > { %v488_v61 = vadd.f32 %v480_v57, %v439_v51  ;;  %v489_v62 = vadd.f32 %v481_v58, %v440_v55  ;;  %v529_v63 = vmax.f32 %v521_v59, 0.0 }
  0x4b   : > { %v530_v0 = vmax.f32 %v522_v60, 0.0 }
  0x4c   : > { %v537_v1 = vadd.f32 %v529_v63, %v488_v61 }
  0x4d   : > { %v538_v2 = vadd.f32 %v530_v0, %v489_v62 }
  0x4f   : > { %v542_v3 = vpack.c.bf16 %v538_v2, %v537_v1 }
  0x51   : > { %831 = vmatmul.mubr.msk.bf16.vlgmr.msra.gmra.mxu1 %vm544_vm1, %v542_v3 }
 0x107   : > { %v828_v18 = vpop.f32.mrf.mxu0 }
 0x108   : > { %628 = vst [vmem:[%s339_s17 + $0x10] sm:$0xff] %v828_v18 }
 0x109   : > { %v595_v27 = vpop.f32.mrf.mxu0 }
 0x10a   : > { %626 = vst [vmem:[%s339_s17] sm:$0xff] %v595_v27 }
 0x10b   : > { %v829_v4 = vpop.f32.mrf.mxu0 }
 0x10c   : > { %629 = vst [vmem:[%s339_s17 + $0x18] sm:$0xff] %v829_v4 }
 0x10d   : > { %v598_v5 = vpop.f32.mrf.mxu0 }
 0x10e   : > { %627 = vst [vmem:[%s339_s17 + $0x8] sm:$0xff] %v598_v5 }
 0x111   : > { %v832_v6 = vpop.f32.mrf.mxu1 }
 0x112   : > { %632 = vst [vmem:[%s339_s17 + $0x30] sm:$0xff] %v832_v6 }
 0x113   : > { %v611_v7 = vpop.f32.mrf.mxu1 }
 0x114   : > { %630 = vst [vmem:[%s339_s17 + $0x20] sm:$0xff] %v611_v7 }
 0x115   : > { %v833_v8 = vpop.f32.mrf.mxu1 }
 0x116   : > { %633 = vst [vmem:[%s339_s17 + $0x38] sm:$0xff] %v833_v8 }
 0x117   : > { %v614_v9 = vpop.f32.mrf.mxu1 }
 0x118   : > { %631 = vst [vmem:[%s339_s17 + $0x28] sm:$0xff] %v614_v9 }
 0x119 PF: > { %p10_p9 = scmp.ge.s32.totalorder %s923_s16, 4   ;;  %s1079_s12 = smov %s880_s13 }
 0x11a   : > { %s1080_s13 = smov %s932_s19  ;;  %s1081_s14 = smov %s923_s16 }
 0x11b   :  { %12 = sbr.rel (!%p10_p9) target bundleno = 2 (0x2), region = 111 }

</bundles_post_ra>
